<compile_context>
chip_gen: v7x
topology: tpu7x:2x2x1
jax: 0.10.0
libtpu: 0.0.40
codegen_flags: <defaults>
</compile_context>

<pallas_src>
import functools
import math

import jax
import jax.numpy as jnp
from jax import lax
from jax.experimental import pallas as pl
from jax.experimental.pallas import tpu as pltpu

_MiB = 1024 * 1024


def _separate_fcs_kernel(x_ref, w_ref, o_ref, *, norm):
    """x_ref: [pt, n, c_in], w_ref: [pt, c_in, c_out], o_ref: [pt, n, c_out]."""
    x = x_ref[...]
    w = w_ref[...]
    if norm:
        # F.normalize(fc_bin, dim=1): L2-normalize along c_in, reduced in f32.
        # Clamping sumsq with eps^2 == clamping the norm with eps=1e-12
        # (sqrt is monotone); rsqrt + multiply rides the EUP slot.
        w32 = w.astype(jnp.float32)
        sumsq = jnp.sum(w32 * w32, axis=1, keepdims=True)        # [pt, 1, c_out]
        inv_norm = lax.rsqrt(jnp.maximum(sumsq, 1e-24))
        w = (w32 * inv_norm).astype(w.dtype)
    # Explicit batched dot_general (batch over parts, contract c_in) so Mosaic
    # emits `pt` back-to-back MXU matmuls rather than risking a broadcast-mul
    # + reduce fallback for a batched einsum. Accumulate in f32.
    cd = jnp.promote_types(x.dtype, w.dtype)
    out = lax.dot_general(
        x.astype(cd), w.astype(cd),
        dimension_numbers=(((2,), (1,)), ((0,), (0,))),
        preferred_element_type=jnp.float32,
    )                                                            # [pt, n, c_out]
    o_ref[...] = out.astype(o_ref.dtype)


def _tpu_topology():
    """Return (per-core VMEM capacity bytes, has-two-TensorCores?), with safe fallbacks."""
    capacity = None
    try:
        capacity = int(pltpu.get_tpu_info().vmem_capacity_bytes)
    except Exception:
        pass
    kind = ""
    try:
        kind = jax.devices()[0].device_kind.lower()
    except Exception:
        pass
    # 64 MiB per-TC VMEM is the v7x signature (v5e/v6e have 128 MiB).
    two_tc = ("v7" in kind) or (capacity is not None and capacity <= 64 * _MiB)
    if capacity is None:
        capacity = 64 * _MiB  # conservative fallback (smallest per-TC VMEM)
    return capacity, two_tc


def _choose_p_tile(p, per_part_bytes, vmem_budget_bytes, *, min_grid,
                   prefer_even_grid):
    """Largest part tile whose double-buffered blocks fit the VMEM budget.

    No divisor-of-p requirement: the grid is cdiv(p, pt) and Pallas clips the
    tail block on store. `min_grid` keeps enough steps for DMA/compute
    pipelining (and, on v7x, for both TensorCores to double-buffer).
    """
    max_fit = max(1, min(p, vmem_budget_bytes // (2 * per_part_bytes)))
    # Smallest grid length achievable under the VMEM fit constraint, then
    # raised to min_grid (and to an even count on two-TC chips for balance).
    grid = max(min_grid, pl.cdiv(p, max_fit))
    if prefer_even_grid and grid % 2:
        grid += 1
    grid = min(grid, p)
    return pl.cdiv(p, grid)


def separate_fcs(x, fc_bin, norm=False, *, weight_dtype=None,
                 part_major_output=False):
    """x: [n, c_in, p], fc_bin: [p, c_in, c_out] -> out: [n, c_out, p].

    weight_dtype: optionally stream fc_bin at a narrower dtype (e.g.
        jnp.bfloat16) to halve the dominant HBM weight traffic. MXU
        accumulation and the norm reduction stay in f32.
    part_major_output: return the kernel-native [p, n, c_out] layout and skip
        the lane-scattering [n, c_out, p] permute (a full extra HBM pass) for
        consumers that accept part-major activations.
    """
    n, c_in, p = x.shape
    p_w, c_in_w, c_out = fc_bin.shape
    assert p == p_w and c_in == c_in_w

    w = fc_bin if weight_dtype is None else fc_bin.astype(weight_dtype)

    # Part-major view of x; allow_input_fusion lets XLA fold this transpose
    # into the kernel's input DMA rather than materializing an extra HBM pass.
    # TODO(synk): verify in the HLO/xprof that the transpose is actually fused;
    # if not, hand x over part-major from the producer.
    x_perm = jnp.transpose(x, (2, 0, 1))                          # [p, n, c_in]

    x_bytes = jnp.dtype(x.dtype).itemsize
    w_bytes = jnp.dtype(w.dtype).itemsize
    o_bytes = x_bytes
    per_part = (n * c_in * x_bytes + c_in * c_out * w_bytes
                + n * c_out * o_bytes)

    capacity, two_tc = _tpu_topology()
    # Generation-aware budget: ~40 MiB on v7x (64 MiB/TC), ~56 MiB on
    # v5e/v6e (128 MiB physical; scoped limit raised explicitly below).
    budget = min((capacity * 5) // 8, 56 * _MiB)
    pt = _choose_p_tile(
        p, per_part, budget,
        # Two-TC chips: >= 4 even grid steps so each core still pipelines;
        # single-TC chips: >= 2 steps purely for DMA/compute overlap.
        min_grid=4 if two_tc else 2,
        prefer_even_grid=two_tc,
    )
    grid = (pl.cdiv(p, pt),)

    needed = 2 * pt * per_part                   # double-buffered in/out blocks
    vmem_limit = int(min(capacity - 8 * _MiB,
                         max(32 * _MiB, needed + 8 * _MiB)))

    kernel = functools.partial(_separate_fcs_kernel, norm=norm)

    cost = pl.CostEstimate(
        flops=2 * p * n * c_in * c_out,
        transcendentals=(p * c_out) if norm else 0,   # rsqrt per (part, c_out)
        bytes_accessed=(p * n * c_in * x_bytes + p * c_in * c_out * w_bytes
                        + p * n * c_out * o_bytes),
    )

    # NOTE: output lane density — common gait configs (c_out = 128/256) give
    # unmasked lane-dense stores; c_out not a multiple of 128 lowers to masked
    # partial stores (fine for small demo shapes, avoid for production sizes).
    out_pnc = pl.pallas_call(
        kernel,
        out_shape=jax.ShapeDtypeStruct((p, n, c_out), x.dtype),
        grid_spec=pltpu.PrefetchScalarGridSpec(
            num_scalar_prefetch=0,
            grid=grid,
            in_specs=[
                pl.BlockSpec((pt, n, c_in), lambda i: (i, 0, 0)),
                # TODO(synk): if xprof shows DMA gaps between grid steps, sweep
                # pipeline_mode=pl.Buffered(3) on this (dominant) weight stream.
                pl.BlockSpec((pt, c_in, c_out), lambda i: (i, 0, 0)),
            ],
            out_specs=pl.BlockSpec((pt, n, c_out), lambda i: (i, 0, 0)),
        ),
        compiler_params=pltpu.CompilerParams(
            dimension_semantics=("parallel",),
            allow_input_fusion=[True, False],
            vmem_limit_bytes=vmem_limit,
        ),
        cost_estimate=cost,
    )(x_perm, w)                                                  # [p, n, c_out]

    if part_major_output:
        return out_pnc
    # PyTorch semantics: out.permute(1, 2, 0) -> [n, c_out, p]. This permute
    # puts p on the lane axis (a full extra HBM pass); consumers that can take
    # part-major activations should pass part_major_output=True instead.
    return jnp.transpose(out_pnc, (1, 2, 0))


def init_fc_bin(key, parts_num, in_channels, out_channels, dtype=jnp.float32):
    # Deterministic xavier_uniform-style init for shape (p, c_in, c_out):
    # fan_in = c_in * c_out, fan_out = p * c_out (matches torch's fan calc).
    fan_in = in_channels * out_channels
    fan_out = parts_num * out_channels
    bound = math.sqrt(6.0 / (fan_in + fan_out))
    return jax.random.uniform(
        key, (parts_num, in_channels, out_channels), dtype,
        minval=-bound, maxval=bound,
    )


if __name__ == "__main__":
    key = jax.random.PRNGKey(0)
    k_x, k_w = jax.random.split(key)

    # Small but representative: p = 31 (prime) exercises the non-divisible
    # (cdiv) part grid with a clipped tail block.
    n, c_in, c_out, parts_num = 2, 32, 16, 31
    x = jax.random.normal(k_x, (n, c_in, parts_num), dtype=jnp.float32)
    fc_bin = init_fc_bin(k_w, parts_num, c_in, c_out)

    fwd = jax.jit(
        separate_fcs,
        static_argnames=("norm", "weight_dtype", "part_major_output"),
    )

    # Plain-JAX reference (same math as the PyTorch forward).
    x_p = jnp.transpose(x, (2, 0, 1))                       # [p, n, c_in]
    ref = jnp.transpose(jnp.einsum("pnc,pco->pno", x_p, fc_bin), (1, 2, 0))

    out = jax.block_until_ready(fwd(x, fc_bin, norm=False))
    assert out.shape == (n, c_out, parts_num)
    assert jnp.allclose(out, ref, atol=1e-5, rtol=1e-5)

    # norm=True branch (kernel uses f32 rsqrt on the EUP -> slightly looser tol).
    out_norm = jax.block_until_ready(fwd(x, fc_bin, norm=True))
    w_n = fc_bin / jnp.maximum(
        jnp.linalg.norm(fc_bin, axis=1, keepdims=True), 1e-12)
    ref_n = jnp.transpose(jnp.einsum("pnc,pco->pno", x_p, w_n), (1, 2, 0))
    assert jnp.allclose(out_norm, ref_n, atol=1e-3, rtol=1e-3)

    # bf16 weight streaming (halves the dominant HBM weight traffic);
    # accumulation stays f32, so only the bf16 rounding of weights shows up.
    out_bf16 = jax.block_until_ready(
        fwd(x, fc_bin, norm=False, weight_dtype=jnp.bfloat16))
    ref_bf16 = jnp.transpose(
        jnp.einsum("pnc,pco->pno", x_p,
                   fc_bin.astype(jnp.bfloat16).astype(jnp.float32)),
        (1, 2, 0))
    assert jnp.allclose(out_bf16, ref_bf16, atol=1e-2, rtol=1e-2)

    # Part-major output path (skips the lane-scattering output permute).
    out_pm = jax.block_until_ready(
        fwd(x, fc_bin, norm=False, part_major_output=True))
    assert out_pm.shape == (parts_num, n, c_out)
    assert jnp.allclose(jnp.transpose(out_pm, (1, 2, 0)), ref,
                        atol=1e-5, rtol=1e-5)

    print("KERNEL_OK")
</pallas_src>

<mosaic_0001>
module attributes {stable_mosaic.version = 11 : i64} {
  func.func @_separate_fcs_kernel(%arg0: i32, %arg1: memref<16x2x32xf32, #tpu.memory_space<vmem>>, %arg2: memref<16x32x16xf32, #tpu.memory_space<vmem>>, %arg3: memref<16x2x16xf32, #tpu.memory_space<vmem>>) attributes {dimension_semantics = [#tpu.dimension_semantics<parallel>], iteration_bounds = array<i64: 2>, scalar_prefetch = 0 : i64, scratch_operands = 0 : i64, tpu.core_type = #tpu.core_type<tc>, window_params = [{transform_indices = @transform_0, window_bounds = array<i64: 16, 2, 32>}, {transform_indices = @transform_1, window_bounds = array<i64: 16, 32, 16>}, {transform_indices = @transform_2, window_bounds = array<i64: 16, 2, 16>}]} {
    %c0 = arith.constant 0 : index
    %c0_0 = arith.constant 0 : index
    %c0_1 = arith.constant 0 : index
    %0 = vector.load %arg1[%c0, %c0_0, %c0_1] : memref<16x2x32xf32, #tpu.memory_space<vmem>>, vector<16x2x32xf32>
    %c0_2 = arith.constant 0 : index
    %c0_3 = arith.constant 0 : index
    %c0_4 = arith.constant 0 : index
    %1 = vector.load %arg2[%c0_2, %c0_3, %c0_4] : memref<16x32x16xf32, #tpu.memory_space<vmem>>, vector<16x32x16xf32>
    %cst = arith.constant dense<0.000000e+00> : vector<16x2x16xf32>
    %2 = tpu.matmul %0, %1, %cst {dimension_numbers = #tpu.dot_dimension_numbers<[2], [1], [1], [2], [0, 0, 0, 1, 1, 2], [0], [0]>} : vector<16x2x32xf32>, vector<16x32x16xf32>, vector<16x2x16xf32> -> vector<16x2x16xf32>
    %c0_5 = arith.constant 0 : index
    %c0_6 = arith.constant 0 : index
    %c0_7 = arith.constant 0 : index
    %3 = vector.load %arg3[%c0_5, %c0_6, %c0_7] : memref<16x2x16xf32, #tpu.memory_space<vmem>>, vector<16x2x16xf32>
    tpu.vector_store %arg3[%c0_5, %c0_6, %c0_7], %2 {strides = array<i32>} : memref<16x2x16xf32, #tpu.memory_space<vmem>>, vector<16x2x16xf32>,
    return
  }
  func.func @transform_0(%arg0: i32) -> (i32, i32, i32) {
    %c0_i32 = arith.constant 0 : i32
    %c0_i32_0 = arith.constant 0 : i32
    %c0_i32_1 = arith.constant 0 : i32
    return %arg0, %c0_i32, %c0_i32_0 : i32, i32, i32
  }
  func.func @transform_1(%arg0: i32) -> (i32, i32, i32) {
    %c0_i32 = arith.constant 0 : i32
    %c0_i32_0 = arith.constant 0 : i32
    %c0_i32_1 = arith.constant 0 : i32
    return %arg0, %c0_i32, %c0_i32_0 : i32, i32, i32
  }
  func.func @transform_2(%arg0: i32) -> (i32, i32, i32) {
    %c0_i32 = arith.constant 0 : i32
    %c0_i32_0 = arith.constant 0 : i32
    %c0_i32_1 = arith.constant 0 : i32
    return %arg0, %c0_i32, %c0_i32_0 : i32, i32, i32
  }
}

</mosaic_0001>

<bundles_post_ra>
// kernel: separate_fcs.2
= control target key start
LH: loop header
LB: loop body
LE: loop exit
PB: predicated region body
PF: predicated region fallthrough
CT: control target
= control target key end

     0   :  { %s2463_s9 = smov 0   ;;  %s2465_s10 = smov 0   ;;  %s2796_s0 = inlined_call_operand.vmem [shape: f32[31,32,16], index: 0, kind: input, shape index: {}]   ;;  %s2797_s1 = inlined_call_operand.vmem [shape: f32[2,32,31], index: 1, kind: input, shape index: {}]   ;;  %s2798_s2 = inlined_call_operand.vmem [shape: f32[31,2,16], index: 2, kind: output, shape index: {}]  }
   0x1   :  { %s2467_s11 = smov 0  }
   0x2 LB: > { %s2476_s12 = sadd.s32 4294967295, %s2411_s11   ;;  %s2478_s13 = sadd.s32 1, %s2411_s11   ;;  %s2411_s11 = sphi %s2467_s11, %s2805_s11   ;;  %s2407_s10 = sphi %s2465_s10, %s2804_s10   ;;  %s2403_s9 = sphi %s2463_s9, %s2803_s9  }
   0x3   : > { %s68_s14 = ssub.s32 %s2411_s11, %s2478_s13  ;;  %s71_s15 = sadd.s32 1, %s2407_s10 }
   0x4   : > { %p69_p0 = scmp.eq.s32.totalorder %s68_s14, 0  ;;  %p81_p1 = scmp.ne.s32.totalorder %s2407_s10, %s2403_s9 }
   0x5   : > { %p82_p2 = scmp.eq.s32.totalorder %s2476_s12, 1  ;;  %p1854_p3 = scmp.ge.s32.totalorder %s2411_s11, 1 }
   0x6   : > { %s2486_s16 = scalar_select %p69_p0, %s2407_s10, %s71_s15  }
   0x7   : > { %p2488_p4 = por %p82_p2, %p81_p1  ;;  %p143_p5 = scmp.lt.s32.totalorder %s2411_s11, 3 }
   0x9   : > { %p144_p6 = pnand %p1854_p3, %p143_p5 }
   0xb   : > { %147 = sbr.rel (%p144_p6) target bundleno = 364 (0x16c), region = 28 }
  0x12   : > { %s2493_s18 = sshll.u32 %s2476_s12, 4  ;;  %v2445_v0 = vmov 0.0|0.0   ;;  %vm2446_vm0 = vmmov 0   ;;  %v2447_v1 = vmov 0.0   ;;  %vm379_vm1 = vcmask 261120   ;;  %s176_s4 = sand.u32 1, %s2403_s9  }
  0x13   : > { %2170 = vmatprep.subr.bf16.mxu0 %v2445_v0  ;;  %2176 = vmatprep.subr.bf16.mxu1 %v2445_v0  ;;  %p184_p7 = scmp.lt.s32.totalorder %s2493_s18, 30  ;;  %s289_s28 = sadd.s32 15, %s2493_s18  ;;  %vm1548_vm2 = vcmask 123904  }
  0x14   : > { %2002 = vmatprep.mubr.msk.f32.mxu0 %vm2446_vm0, %v2447_v1  ;;  %2013 = vmatprep.mubr.msk.f32.mxu1 %vm2446_vm0, %v2447_v1  ;;  %s290_s29 = ssub.s32 30, %s289_s28  ;;  %s1855_s5 = sshll.u32 %s176_s4, 5 }
  0x15   : > { %s185_s19 = scalar_select %p184_p7, %s2493_s18, 30 }
  0x16   : > { %p291_p8 = scmp.lt.s32.totalorder %s290_s29, 0  ;;  %s2659_s6 = scalar_lea.vmem [#allocation2], %s1855_s5  }
  0x17   : > { %s1910_s20 = sshll.u32 %s185_s19, 5  ;;  %s1857_s21 = sshll.u32 %s185_s19, 1 }
  0x18   : > { %s2506_s24 = scalar_lea.vmem %s2796_s0, %s1910_s20  ;;  %s2511_s27 = scalar_lea.vmem %s2797_s1, %s1857_s21 }
  0x19   : > { %v315_v2 = vld [vmem:[%s2506_s24] sm:$0xff]  ;;  %v316_v3 = vld [vmem:[%s2506_s24 + $0x8] sm:$0xff]  ;;  %v317_v7 = vld [vmem:[%s2506_s24 + $0x10] sm:$0xff]  ;;  %s292_s30 = scalar_select %p291_p8, 0, 255 }
  0x1a   : > { %v319_v4 = vld [vmem:[%s2506_s24 + $0x20] sm:$0xff]  ;;  %v2171_v5 = vpack.c.bf16 %v316_v3, %v315_v2  ;;  %v320_v6 = vld [vmem:[%s2506_s24 + $0x28] sm:$0xff]  ;;  %v318_v8 = vld [vmem:[%s2506_s24 + $0x18] sm:$0xff]  ;;  %s1573_s7 = ssub.s32 (%p2488_p4), 31, %s2493_s18  ;;  %s1911_s8 = sshll.u32 (%p2488_p4), %s2476_s12, 5 }
  0x1b   : > { %v2177_v9 = vpack.c.bf16 %v320_v6, %v319_v4  ;;  %v321_v10 = vld [vmem:[%s2506_s24 + $0x30] sm:$0xff]  ;;  %v322_v11 = vld [vmem:[%s2506_s24 + $0x38] sm:$0xff]  ;;  %v215_v12 = vld [vmem:[%s2511_s27] sm:$0xff]   ;;  %v2174_v13 = vpack.c.bf16 %v318_v8, %v317_v7  ;;  %s293_s3 = sand.u32 3, %s292_s30  ;;  %p1574_p9 = scmp.lt.s32.totalorder (%p2488_p4), %s1573_s7, 16 }
  0x1c   : > { %2172 = vmatpush3.bf16.msra.mxu0 %v2171_v5  ;;  %217 = vst [vmem:[#allocation3] sm:$0xff] %v215_v12   ;;  %v2180_v14 = vpack.c.bf16 %v322_v11, %v321_v10  ;;  %v323_v15 = vld [vmem:[%s2506_s24 + $0x40] sm:$0xff]  ;;  %v324_v16 = vld [vmem:[%s2506_s24 + $0x48] sm:$0xff]  ;;  %v325_v21 = vld [vmem:[%s2506_s24 + $0x50] sm:$0xff]  ;;  %s2700_s14 = scalar_lea.vmem (%p2488_p4), %s2798_s2, %s1911_s8  }
  0x1d   : > { %2178 = vmatpush3.bf16.msra.mxu1 %v2177_v9  ;;  %2173 = vmatprep.subr.bf16.mxu0 %v2445_v0  ;;  %v327_v17 = vld [vmem:[%s2506_s24 + $0x60] sm:$0xff]  ;;  %v328_v18 = vld [vmem:[%s2506_s24 + $0x68] sm:$0xff]  ;;  %v2183_v19 = vpack.c.bf16 %v324_v16, %v323_v15  ;;  %v326_v23 = vld [vmem:[%s2506_s24 + $0x58] sm:$0xff] }
  0x1e   : > { %2179 = vmatprep.subr.bf16.mxu1 %v2445_v0  ;;  %v2189_v20 = vpack.c.bf16 %v328_v18, %v327_v17  ;;  %v1865_v22 = vld [vmem:[%s2511_s27 + $0x8] sm:$0xff]   ;;  %v329_v24 = vld [vmem:[%s2506_s24 + $0x70] sm:$0xff]  ;;  %v330_v25 = vld [vmem:[%s2506_s24 + $0x78] sm:$0xff]  ;;  %v2186_v28 = vpack.c.bf16 %v326_v23, %v325_v21 }
  0x1f   : > { %237 = vst [vmem:[#allocation3 + $0x8] sm:$0xff] %v1865_v22   ;;  %v2192_v29 = vpack.c.bf16 %v330_v25, %v329_v24  ;;  %v331_v30 = vld [vmem:[%s2506_s24 + $0x80] sm:$0xff]  ;;  %v332_v31 = vld [vmem:[%s2506_s24 + $0x88] sm:$0xff]  ;;  %v1869_v34 = vld [vmem:[%s2511_s27 + $0x10] sm:$0xff]  }
  0x20   : > { %2175 = vmatpush3.bf16.msra.mxu0 %v2174_v13  ;;  %v335_v32 = vld [vmem:[%s2506_s24 + $0xa0] sm:$0xff]  ;;  %v336_v33 = vld [vmem:[%s2506_s24 + $0xa8] sm:$0xff]  ;;  %v2195_v37 = vpack.c.bf16 %v332_v31, %v331_v30  ;;  %v333_v39 = vld [vmem:[%s2506_s24 + $0x90] sm:$0xff]  ;;  %257 = vst [vmem:[#allocation3 + $0x10] sm:$0xff] %v1869_v34  }
  0x21   : > { %2181 = vmatpush3.bf16.msra.mxu1 %v2180_v14  ;;  %2182 = vmatprep.subr.bf16.mxu0 %v2445_v0  ;;  %v2201_v38 = vpack.c.bf16 %v336_v33, %v335_v32  ;;  %v334_v40 = vld [vmem:[%s2506_s24 + $0x98] sm:$0xff]  ;;  %v337_v41 = vld [vmem:[%s2506_s24 + $0xb0] sm:$0xff]  ;;  %v339_v45 = vld [vmem:[%s2506_s24 + $0xc0] sm:$0xff] }
  0x22   : > { %2188 = vmatprep.subr.bf16.mxu1 %v2445_v0  ;;  %v338_v42 = vld [vmem:[%s2506_s24 + $0xb8] sm:$0xff]  ;;  %v2198_v43 = vpack.c.bf16 %v334_v40, %v333_v39  ;;  %v340_v46 = vld [vmem:[%s2506_s24 + $0xc8] sm:$0xff]  ;;  %v343_v47 = vld [vmem:[%s2506_s24 + $0xe0] sm:$0xff] }
  0x23   : > { %v299_v26 = vld [vmem:[#allocation3] sm:$0x3]  ;;  %v300_v27 = vld [vmem:[#allocation3 + $0x2] sm:$0x3]  ;;  %v301_v35 = vld [vmem:[#allocation3 + $0x4] sm:$0x3]  ;;  %v2204_v44 = vpack.c.bf16 %v338_v42, %v337_v41  ;;  %v2207_v52 = vpack.c.bf16 %v340_v46, %v339_v45 }
  0x24   : > { %2003 = vmatmul.mubr.msk.f32.vlgmr.msra.gmra.mrb[0].mxu0 %vm379_vm1, %v299_v26  ;;  %2014 = vmatmul.mubr.msk.f32.vlgmr.msra.gmra.mrb[0].mxu1 %vm379_vm1, %v300_v27  ;;  %v302_v36 = vld [vmem:[#allocation3 + $0x6] sm:$0x3]  ;;  %v344_v48 = vld [vmem:[%s2506_s24 + $0xe8] sm:$0xff]  ;;  %v1873_v49 = vld [vmem:[%s2511_s27 + $0x18] sm:$0xf]  }
  0x25   : > { %2184 = vmatpush3.bf16.msra.mxu0 %v2183_v19  ;;  %2190 = vmatpush3.bf16.msra.mxu1 %v2189_v20  ;;  %277 = vst [vmem:[#allocation3 + $0x18] sm:$0xf] %v1873_v49   ;;  %v2213_v53 = vpack.c.bf16 %v344_v48, %v343_v47  ;;  %v341_v54 = vld [vmem:[%s2506_s24 + $0xd0] sm:$0xff]  ;;  %v342_v55 = vld [vmem:[%s2506_s24 + $0xd8] sm:$0xff]  ;;  %v347_v62 = vld [vmem:[%s2506_s24 + $0x100] sm:$0xff] }
  0x26   : > { %2185 = vmatprep.subr.bf16.mxu0 %v2445_v0  ;;  %2191 = vmatprep.subr.bf16.mxu1 %v2445_v0  ;;  %v303_v50 = vld [vmem:[#allocation3 + $0x8] sm:$0x3]  ;;  %v304_v51 = vld [vmem:[#allocation3 + $0xa] sm:$0x3]  ;;  %v345_v56 = vld [vmem:[%s2506_s24 + $0xf0] sm:$0xff]  ;;  %v2210_v60 = vpack.c.bf16 %v342_v55, %v341_v54 }
  0x27   : > { %2024 = vmatprep.mubr.msk.f32.mxu0 %vm2446_vm0, %v2447_v1  ;;  %2035 = vmatprep.mubr.msk.f32.mxu1 %vm2446_vm0, %v2447_v1  ;;  %v346_v57 = vld [vmem:[%s2506_s24 + $0xf8] sm:$0xff]  ;;  %v348_v63 = vld [vmem:[%s2506_s24 + $0x108] sm:$0xff]  ;;  %v351_v2 = vld [vmem:[%s2506_s24 + $0x120] sm:$0xff] }
  0x28   : > { %v1875_v58 = vld [vmem:[%s2511_s27 + $0x1c] sm:$0x3]  ;;  %v1876_v59 = vld [vmem:[%s2511_s27 + $0x1e] sm:%s293_s3]  ;;  %v2216_v61 = vpack.c.bf16 %v346_v57, %v345_v56  ;;  %v352_v3 = vld [vmem:[%s2506_s24 + $0x128] sm:$0xff]  ;;  %v2219_v6 = vpack.c.bf16 %v348_v63, %v347_v62 }
  0x29   : > { %2187 = vmatpush3.bf16.msra.mxu0 %v2186_v28  ;;  %2193 = vmatpush3.bf16.msra.mxu1 %v2192_v29  ;;  %287 = vst [vmem:[#allocation3 + $0x1c] sm:$0x3] %v1875_v58  ;;  %298 = vst [vmem:[#allocation3 + $0x1e] sm:$0x3] %v1876_v59  ;;  %v305_v4 = vld [vmem:[#allocation3 + $0xc] sm:$0x3]  ;;  %v2225_v7 = vpack.c.bf16 %v352_v3, %v351_v2 }
  0x2a   : > { %2194 = vmatprep.subr.bf16.mxu0 %v2445_v0  ;;  %2200 = vmatprep.subr.bf16.mxu1 %v2445_v0  ;;  %v306_v5 = vld [vmem:[#allocation3 + $0xe] sm:$0x3]  ;;  %v349_v8 = vld [vmem:[%s2506_s24 + $0x110] sm:$0xff]  ;;  %v350_v9 = vld [vmem:[%s2506_s24 + $0x118] sm:$0xff] }
  0x2b   : > { %v353_v10 = vld [vmem:[%s2506_s24 + $0x130] sm:$0xff]  ;;  %v354_v11 = vld [vmem:[%s2506_s24 + $0x138] sm:$0xff]  ;;  %v2222_v12 = vpack.c.bf16 %v350_v9, %v349_v8  ;;  %v355_v14 = vld [vmem:[%s2506_s24 + $0x140] sm:$0xff] }
  0x2c   : > { %2025 = vmatmul.mubr.msk.f32.vlgmr.msra.gmra.mrb[2].mxu0 %vm379_vm1, %v301_v35  ;;  %2036 = vmatmul.mubr.msk.f32.vlgmr.msra.gmra.mrb[2].mxu1 %vm379_vm1, %v302_v36  ;;  %v2228_v13 = vpack.c.bf16 %v354_v11, %v353_v10  ;;  %v356_v15 = vld [vmem:[%s2506_s24 + $0x148] sm:$0xff]  ;;  %v359_v16 = vld [vmem:[%s2506_s24 + $0x160] sm:$0xff]  ;;  %v307_v18 = vld [vmem:[#allocation3 + $0x10] sm:$0x3] }
  0x2d   : > { %2196 = vmatpush3.bf16.msra.mxu0 %v2195_v37  ;;  %2202 = vmatpush3.bf16.msra.mxu1 %v2201_v38  ;;  %v360_v17 = vld [vmem:[%s2506_s24 + $0x168] sm:$0xff]  ;;  %v308_v19 = vld [vmem:[#allocation3 + $0x12] sm:$0x3]  ;;  %v2231_v20 = vpack.c.bf16 %v356_v15, %v355_v14  ;;  %v358_v23 = vld [vmem:[%s2506_s24 + $0x158] sm:$0xff] }
  0x2e   : > { %2197 = vmatprep.subr.bf16.mxu0 %v2445_v0  ;;  %2203 = vmatprep.subr.bf16.mxu1 %v2445_v0  ;;  %v2237_v21 = vpack.c.bf16 %v360_v17, %v359_v16  ;;  %v357_v22 = vld [vmem:[%s2506_s24 + $0x150] sm:$0xff]  ;;  %v362_v25 = vld [vmem:[%s2506_s24 + $0x178] sm:$0xff]  ;;  %v363_v28 = vld [vmem:[%s2506_s24 + $0x180] sm:$0xff] }
  0x2f   : > { %2046 = vmatprep.mubr.msk.f32.mxu0 %vm2446_vm0, %v2447_v1  ;;  %2057 = vmatprep.mubr.msk.f32.mxu1 %vm2446_vm0, %v2447_v1  ;;  %v361_v24 = vld [vmem:[%s2506_s24 + $0x170] sm:$0xff]  ;;  %v2234_v26 = vpack.c.bf16 %v358_v23, %v357_v22  ;;  %v364_v29 = vld [vmem:[%s2506_s24 + $0x188] sm:$0xff]  ;;  %v367_v30 = vld [vmem:[%s2506_s24 + $0x1a0] sm:$0xff] }
  0x30   : > { %v2240_v27 = vpack.c.bf16 %v362_v25, %v361_v24  ;;  %v368_v31 = vld [vmem:[%s2506_s24 + $0x1a8] sm:$0xff]  ;;  %v309_v32 = vld [vmem:[#allocation3 + $0x14] sm:$0x3]  ;;  %v310_v33 = vld [vmem:[#allocation3 + $0x16] sm:$0x3]  ;;  %v2243_v34 = vpack.c.bf16 %v364_v29, %v363_v28 }
  0x31   : > { %2199 = vmatpush3.bf16.msra.mxu0 %v2198_v43  ;;  %2205 = vmatpush3.bf16.msra.mxu1 %v2204_v44  ;;  %v2249_v35 = vpack.c.bf16 %v368_v31, %v367_v30  ;;  %v365_v36 = vld [vmem:[%s2506_s24 + $0x190] sm:$0xff]  ;;  %v366_v37 = vld [vmem:[%s2506_s24 + $0x198] sm:$0xff]  ;;  %v371_v42 = vld [vmem:[%s2506_s24 + $0x1c0] sm:$0xff] }
  0x32   : > { %2206 = vmatprep.subr.bf16.mxu0 %v2445_v0  ;;  %2212 = vmatprep.subr.bf16.mxu1 %v2445_v0  ;;  %v369_v38 = vld [vmem:[%s2506_s24 + $0x1b0] sm:$0xff]  ;;  %v370_v39 = vld [vmem:[%s2506_s24 + $0x1b8] sm:$0xff]  ;;  %v2246_v40 = vpack.c.bf16 %v366_v37, %v365_v36  ;;  %v372_v43 = vld [vmem:[%s2506_s24 + $0x1c8] sm:$0xff] }
  0x33   : > { %v2252_v41 = vpack.c.bf16 %v370_v39, %v369_v38  ;;  %v375_v44 = vld [vmem:[%s2506_s24 + $0x1e0] sm:$0xff]  ;;  %v376_v45 = vld [vmem:[%s2506_s24 + $0x1e8] sm:$0xff]  ;;  %v311_v46 = vld [vmem:[#allocation3 + $0x18] sm:$0x3]  ;;  %v2255_v48 = vpack.c.bf16 %v372_v43, %v371_v42 }
  0x34   : > { %2047 = vmatmul.mubr.msk.f32.vlgmr.msra.gmra.mrb[4].mxu0 %vm379_vm1, %v303_v50  ;;  %2058 = vmatmul.mubr.msk.f32.vlgmr.msra.gmra.mrb[4].mxu1 %vm379_vm1, %v304_v51  ;;  %v312_v47 = vld [vmem:[#allocation3 + $0x1a] sm:$0x3]  ;;  %v2261_v49 = vpack.c.bf16 %v376_v45, %v375_v44  ;;  %v373_v50 = vld [vmem:[%s2506_s24 + $0x1d0] sm:$0xff]  ;;  %v313_v56 = vld [vmem:[#allocation3 + $0x1c] sm:$0x3] }
  0x35   : > { %2208 = vmatpush3.bf16.msra.mxu0 %v2207_v52  ;;  %2214 = vmatpush3.bf16.msra.mxu1 %v2213_v53  ;;  %v374_v51 = vld [vmem:[%s2506_s24 + $0x1d8] sm:$0xff]  ;;  %v377_v52 = vld [vmem:[%s2506_s24 + $0x1f0] sm:$0xff] }
  0x36   : > { %2209 = vmatprep.subr.bf16.mxu0 %v2445_v0  ;;  %2215 = vmatprep.subr.bf16.mxu1 %v2445_v0  ;;  %v378_v53 = vld [vmem:[%s2506_s24 + $0x1f8] sm:$0xff]  ;;  %v2258_v54 = vpack.c.bf16 %v374_v51, %v373_v50 }
  0x37   : > { %2068 = vmatprep.mubr.msk.f32.mxu0 %vm2446_vm0, %v2447_v1  ;;  %2079 = vmatprep.mubr.msk.f32.mxu1 %vm2446_vm0, %v2447_v1  ;;  %v2264_v55 = vpack.c.bf16 %v378_v53, %v377_v52  ;;  %v314_v57 = vld [vmem:[#allocation3 + $0x1e] sm:$0x3] }
  0x39   : > { %2211 = vmatpush3.bf16.msra.mxu0 %v2210_v60  ;;  %2217 = vmatpush3.bf16.msra.mxu1 %v2216_v61 }
  0x3a   : > { %2218 = vmatprep.subr.bf16.mxu0 %v2445_v0  ;;  %2224 = vmatprep.subr.bf16.mxu1 %v2445_v0 }
  0x3c   : > { %2069 = vmatmul.mubr.msk.f32.vlgmr.msra.gmra.mrb[6].mxu0 %vm379_vm1, %v305_v4  ;;  %2080 = vmatmul.mubr.msk.f32.vlgmr.msra.gmra.mrb[6].mxu1 %vm379_vm1, %v306_v5 }
  0x3d   : > { %2220 = vmatpush3.bf16.msra.mxu0 %v2219_v6  ;;  %2226 = vmatpush3.bf16.msra.mxu1 %v2225_v7 }
  0x3e   : > { %2221 = vmatprep.subr.bf16.mxu0 %v2445_v0  ;;  %2227 = vmatprep.subr.bf16.mxu1 %v2445_v0 }
  0x3f   : > { %2090 = vmatprep.mubr.msk.f32.mxu0 %vm2446_vm0, %v2447_v1  ;;  %2101 = vmatprep.mubr.msk.f32.mxu1 %vm2446_vm0, %v2447_v1 }
  0x41   : > { %2223 = vmatpush3.bf16.msra.mxu0 %v2222_v12  ;;  %2229 = vmatpush3.bf16.msra.mxu1 %v2228_v13 }
  0x42   : > { %2230 = vmatprep.subr.bf16.mxu0 %v2445_v0  ;;  %2236 = vmatprep.subr.bf16.mxu1 %v2445_v0 }
  0x44   : > { %2091 = vmatmul.mubr.msk.f32.vlgmr.msra.gmra.mrb[8].mxu0 %vm379_vm1, %v307_v18  ;;  %2102 = vmatmul.mubr.msk.f32.vlgmr.msra.gmra.mrb[8].mxu1 %vm379_vm1, %v308_v19 }
  0x45   : > { %2232 = vmatpush3.bf16.msra.mxu0 %v2231_v20  ;;  %2238 = vmatpush3.bf16.msra.mxu1 %v2237_v21 }
  0x46   : > { %2233 = vmatprep.subr.bf16.mxu0 %v2445_v0  ;;  %2239 = vmatprep.subr.bf16.mxu1 %v2445_v0 }
  0x47   : > { %2112 = vmatprep.mubr.msk.f32.mxu0 %vm2446_vm0, %v2447_v1  ;;  %2123 = vmatprep.mubr.msk.f32.mxu1 %vm2446_vm0, %v2447_v1 }
  0x49   : > { %2235 = vmatpush3.bf16.msra.mxu0 %v2234_v26  ;;  %2241 = vmatpush3.bf16.msra.mxu1 %v2240_v27 }
  0x4a   : > { %2242 = vmatprep.subr.bf16.mxu0 %v2445_v0  ;;  %2248 = vmatprep.subr.bf16.mxu1 %v2445_v0 }
  0x4c   : > { %2113 = vmatmul.mubr.msk.f32.vlgmr.msra.gmra.mrb[10].mxu0 %vm379_vm1, %v309_v32  ;;  %2124 = vmatmul.mubr.msk.f32.vlgmr.msra.gmra.mrb[10].mxu1 %vm379_vm1, %v310_v33 }
  0x4d   : > { %2244 = vmatpush3.bf16.msra.mxu0 %v2243_v34  ;;  %2250 = vmatpush3.bf16.msra.mxu1 %v2249_v35 }
  0x4e   : > { %2245 = vmatprep.subr.bf16.mxu0 %v2445_v0  ;;  %2251 = vmatprep.subr.bf16.mxu1 %v2445_v0 }
  0x4f   : > { %2134 = vmatprep.mubr.msk.f32.mxu0 %vm2446_vm0, %v2447_v1  ;;  %2145 = vmatprep.mubr.msk.f32.mxu1 %vm2446_vm0, %v2447_v1 }
  0x51   : > { %2247 = vmatpush3.bf16.msra.mxu0 %v2246_v40  ;;  %2253 = vmatpush3.bf16.msra.mxu1 %v2252_v41 }
  0x52   : > { %2254 = vmatprep.subr.bf16.mxu0 %v2445_v0  ;;  %2260 = vmatprep.subr.bf16.mxu1 %v2445_v0 }
  0x54   : > { %2135 = vmatmul.mubr.msk.f32.vlgmr.msra.gmra.mrb[12].mxu0 %vm379_vm1, %v311_v46  ;;  %2146 = vmatmul.mubr.msk.f32.vlgmr.msra.gmra.mrb[12].mxu1 %vm379_vm1, %v312_v47 }
  0x55   : > { %2256 = vmatpush3.bf16.msra.mxu0 %v2255_v48  ;;  %2262 = vmatpush3.bf16.msra.mxu1 %v2261_v49 }
  0x56   : > { %2257 = vmatprep.subr.bf16.mxu0 %v2445_v0  ;;  %2263 = vmatprep.subr.bf16.mxu1 %v2445_v0 }
  0x57   : > { %2156 = vmatprep.mubr.msk.f32.mxu0 %vm2446_vm0, %v2447_v1  ;;  %2167 = vmatprep.mubr.msk.f32.mxu1 %vm2446_vm0, %v2447_v1 }
  0x59   : > { %2259 = vmatpush3.bf16.msra.mxu0 %v2258_v54  ;;  %2265 = vmatpush3.bf16.msra.mxu1 %v2264_v55 }
  0x5c   : > { %2157 = vmatmul.mubr.msk.f32.vlgmr.msra.gmra.mrb[14].mxu0 %vm379_vm1, %v313_v56  ;;  %2168 = vmatmul.mubr.msk.f32.vlgmr.msra.gmra.mrb[14].mxu1 %vm379_vm1, %v314_v57 }
  0xf7   : > { %v449_v58 = vpop.f32.mrb[0].mxu0  ;;  %v522_v59 = vpop.f32.mrb[0].mxu1 }
  0xf8   : > { %1549 = vst.msk [vmem:[%s2659_s6] sm:$0x3] %vm1548_vm2, %v449_v58  ;;  %1550 = vst.msk [vmem:[%s2659_s6 + $0x2] sm:$0x3] %vm1548_vm2, %v522_v59  ;;  %v2004_v0 = vpop.f32.mrb[1].mxu0  ;;  %v2015_v1 = vpop.f32.mrb[1].mxu1 }
  0xff   : > { %v595_v60 = vpop.f32.mrb[2].mxu0  ;;  %v668_v61 = vpop.f32.mrb[2].mxu1 }
 0x100   : > { %1551 = vst.msk [vmem:[%s2659_s6 + $0x4] sm:$0x3] %vm1548_vm2, %v595_v60  ;;  %1552 = vst.msk [vmem:[%s2659_s6 + $0x6] sm:$0x3] %vm1548_vm2, %v668_v61  ;;  %v2026_v62 = vpop.f32.mrb[3].mxu0  ;;  %v2037_v63 = vpop.f32.mrb[3].mxu1 }
 0x107   : > { %v741_v2 = vpop.f32.mrb[4].mxu0  ;;  %v814_v3 = vpop.f32.mrb[4].mxu1 }
 0x108   : > { %1553 = vst.msk [vmem:[%s2659_s6 + $0x8] sm:$0x3] %vm1548_vm2, %v741_v2  ;;  %1554 = vst.msk [vmem:[%s2659_s6 + $0xa] sm:$0x3] %vm1548_vm2, %v814_v3  ;;  %v2048_v4 = vpop.f32.mrb[5].mxu0  ;;  %v2059_v5 = vpop.f32.mrb[5].mxu1 }
 0x10f   : > { %v887_v6 = vpop.f32.mrb[6].mxu0  ;;  %v960_v7 = vpop.f32.mrb[6].mxu1 }
 0x110   : > { %1555 = vst.msk [vmem:[%s2659_s6 + $0xc] sm:$0x3] %vm1548_vm2, %v887_v6  ;;  %1556 = vst.msk [vmem:[%s2659_s6 + $0xe] sm:$0x3] %vm1548_vm2, %v960_v7  ;;  %v2070_v8 = vpop.f32.mrb[7].mxu0  ;;  %v2081_v9 = vpop.f32.mrb[7].mxu1 }
 0x117   : > { %v1033_v10 = vpop.f32.mrb[8].mxu0  ;;  %v1106_v11 = vpop.f32.mrb[8].mxu1 }
 0x118   : > { %1557 = vst.msk [vmem:[%s2659_s6 + $0x10] sm:$0x3] %vm1548_vm2, %v1033_v10  ;;  %1558 = vst.msk [vmem:[%s2659_s6 + $0x12] sm:$0x3] %vm1548_vm2, %v1106_v11  ;;  %v2092_v12 = vpop.f32.mrb[9].mxu0  ;;  %v2103_v13 = vpop.f32.mrb[9].mxu1 }
 0x11f   : > { %v1179_v14 = vpop.f32.mrb[10].mxu0  ;;  %v1252_v15 = vpop.f32.mrb[10].mxu1 }
 0x120   : > { %1559 = vst.msk [vmem:[%s2659_s6 + $0x14] sm:$0x3] %vm1548_vm2, %v1179_v14  ;;  %1560 = vst.msk [vmem:[%s2659_s6 + $0x16] sm:$0x3] %vm1548_vm2, %v1252_v15  ;;  %v2114_v16 = vpop.f32.mrb[11].mxu0  ;;  %v2125_v17 = vpop.f32.mrb[11].mxu1 }
 0x127   : > { %v1325_v18 = vpop.f32.mrb[12].mxu0  ;;  %v1398_v19 = vpop.f32.mrb[12].mxu1 }
 0x128   : > { %1561 = vst.msk [vmem:[%s2659_s6 + $0x18] sm:$0x3] %vm1548_vm2, %v1325_v18  ;;  %1562 = vst.msk [vmem:[%s2659_s6 + $0x1a] sm:$0x3] %vm1548_vm2, %v1398_v19  ;;  %v2136_v20 = vpop.f32.mrb[13].mxu0  ;;  %v2147_v21 = vpop.f32.mrb[13].mxu1 }
 0x12a   : > { %1571 = sbr.rel (!%p2488_p4) target bundleno = 364 (0x16c), region = 32 }
 0x12f   : > { %v1471_v22 = vpop.f32.mrb[14].mxu0  ;;  %v1544_v23 = vpop.f32.mrb[14].mxu1 }
 0x130   : > { %1563 = vst.msk [vmem:[%s2659_s6 + $0x1c] sm:$0x3] %vm1548_vm2, %v1471_v22  ;;  %1564 = vst.msk [vmem:[%s2659_s6 + $0x1e] sm:$0x3] %vm1548_vm2, %v1544_v23  ;;  %v2158_v24 = vpop.f32.mrb[15].mxu0  ;;  %v2169_v25 = vpop.f32.mrb[15].mxu1 }
 0x131   : > { %s2807_s7 = smov (!%p1574_p9, %s1573_s7), 16 }
 0x132   : > { %s1895_s15 = sshll.u32 %s2807_s7, 5 }
 0x133   : > { %p1898_p10 = scmp.eq.s32.totalorder %s1895_s15, 0 }
 0x134   : > { %s2706_s19 = sshrl.u32 (!%p1898_p10), %s2807_s7, 4 }
 0x135   : > { %1582 = sbr.rel (%p1898_p10) target bundleno = 364 (0x16c), region = 36  ;;  %p1899_p11 = scmp.le.s32.totalorder (!%p1898_p10), %s2706_s19, 0 }
 0x13c   : > { %1801 = sbr.rel (%p1899_p11) target bundleno = 343 (0x157), region = 141  ;;  %s2800_s12 = smov (!%p1899_p11), %s2700_s14 }
 0x13d   : > { %s2801_s17 = smov (!%p1899_p11), %s2659_s6  ;;  %s2715_s18 = smov (!%p1899_p11), 0  }
 0x13e   : > { %s2717_s20 = smov (!%p1899_p11), 0  }
 0x143 LB: >> { %v1598_v26 = vld [vmem:[%s2419_s17] sm:$0x3]  ;;  %v1600_v27 = vld [vmem:[%s2419_s17 + $0x2] sm:$0x3]  ;;  %v1602_v28 = vld [vmem:[%s2419_s17 + $0x4] sm:$0x3]  ;;  %s2427_s20 = sphi %s2717_s20, %s1592_s20   ;;  %s2423_s18 = sphi %s2715_s18, %s2802_s18   ;;  %s2419_s17 = sphi %s2801_s17, %s1635_s17   ;;  %s2415_s12 = sphi %s2800_s12, %s1636_s12  }
 0x144   : >> { %1599 = vst [vmem:[%s2415_s12] sm:$0x3] %v1598_v26  ;;  %1601 = vst [vmem:[%s2415_s12 + $0x2] sm:$0x3] %v1600_v27  ;;  %v1604_v29 = vld [vmem:[%s2419_s17 + $0x6] sm:$0x3]  ;;  %s1630_s21 = sadd.s32 1, %s2423_s18 }
 0x145   : >> { %1603 = vst [vmem:[%s2415_s12 + $0x4] sm:$0x3] %v1602_v28  ;;  %v1606_v30 = vld [vmem:[%s2419_s17 + $0x8] sm:$0x3]  ;;  %v1608_v31 = vld [vmem:[%s2419_s17 + $0xa] sm:$0x3]  ;;  %p1631_p12 = scmp.ge.s32.totalorder %s1630_s21, %s2706_s19 }
 0x146   : >> { %1605 = vst [vmem:[%s2415_s12 + $0x6] sm:$0x3] %v1604_v29  ;;  %1607 = vst [vmem:[%s2415_s12 + $0x8] sm:$0x3] %v1606_v30  ;;  %v1610_v32 = vld [vmem:[%s2419_s17 + $0xc] sm:$0x3] }
 0x147   : >> { %1609 = vst [vmem:[%s2415_s12 + $0xa] sm:$0x3] %v1608_v31  ;;  %v1612_v33 = vld [vmem:[%s2419_s17 + $0xe] sm:$0x3]  ;;  %v1614_v34 = vld [vmem:[%s2419_s17 + $0x10] sm:$0x3] }
 0x148   : >> { %1611 = vst [vmem:[%s2415_s12 + $0xc] sm:$0x3] %v1610_v32  ;;  %1613 = vst [vmem:[%s2415_s12 + $0xe] sm:$0x3] %v1612_v33  ;;  %v1616_v35 = vld [vmem:[%s2419_s17 + $0x12] sm:$0x3] }
 0x149   : >> { %1615 = vst [vmem:[%s2415_s12 + $0x10] sm:$0x3] %v1614_v34  ;;  %v1618_v36 = vld [vmem:[%s2419_s17 + $0x14] sm:$0x3]  ;;  %v1620_v37 = vld [vmem:[%s2419_s17 + $0x16] sm:$0x3] }
 0x14a   : >> { %1617 = vst [vmem:[%s2415_s12 + $0x12] sm:$0x3] %v1616_v35  ;;  %1619 = vst [vmem:[%s2415_s12 + $0x14] sm:$0x3] %v1618_v36  ;;  %v1622_v38 = vld [vmem:[%s2419_s17 + $0x18] sm:$0x3] }
 0x14b   : >> { %1621 = vst [vmem:[%s2415_s12 + $0x16] sm:$0x3] %v1620_v37  ;;  %v1624_v39 = vld [vmem:[%s2419_s17 + $0x1a] sm:$0x3]  ;;  %v1626_v40 = vld [vmem:[%s2419_s17 + $0x1c] sm:$0x3] }
 0x14c   : >> { %1623 = vst [vmem:[%s2415_s12 + $0x18] sm:$0x3] %v1622_v38  ;;  %1625 = vst [vmem:[%s2415_s12 + $0x1a] sm:$0x3] %v1624_v39  ;;  %v1628_v41 = vld [vmem:[%s2419_s17 + $0x1e] sm:$0x3] }
 0x14d   : >> { %1627 = vst [vmem:[%s2415_s12 + $0x1c] sm:$0x3] %v1626_v40  ;;  %1629 = vst [vmem:[%s2415_s12 + $0x1e] sm:$0x3] %v1628_v41  ;;  %s2809_s21 = smov (%p1631_p12, %s1630_s21), 0  ;;  %s1592_s20 = sadd.s32 1, %s2427_s20  }
 0x14e   : >> { %s1900_s22 = sshll.u32 %s2809_s21, 5  ;;  %p1591_p13 = scmp.ge.s32.totalorder %s1592_s20, %s2706_s19 }
 0x14f   : >> { %s1635_s17 = scalar_lea.vmem %s2659_s6, %s1900_s22 [#allocation2]   ;;  %s1636_s12 = scalar_lea.vmem %s2700_s14, %s1900_s22  }
 0x150   : >> { %s2802_s18 = smov %s2809_s21  ;;  %1594 = sbr.rel (!%p1591_p13) target bundleno = 323 (0x143), region = 147 }
 0x157 PF: > { %s2778_s23 = sand.u32 15, %s2807_s7   ;;  %s1912_s24 = sshll.u32 %s2706_s19, 5 }
 0x158   : > { %s1641_s25 = scalar_lea.vmem %s2659_s6, %s1912_s24 [#allocation2]   ;;  %s1643_s26 = scalar_lea.vmem %s2700_s14, %s1912_s24  }
 0x159   : > { %p1905_p0 = scmp.le.s32.totalorder %s2778_s23, 0 }
 0x15a   : > { %s2429_s27 = smov (!%p1905_p0), %s1643_s26   ;;  %s2433_s28 = smov (!%p1905_p0), %s1641_s25  }
 0x15b   : > { %1815 = sbr.rel (%p1905_p0) target bundleno = 364 (0x16c), region = 152  ;;  %s2437_s29 = smov (!%p1905_p0), 0  }
 0x15c   : > { %s2441_s30 = smov (!%p1905_p0), 0  }
 0x162 LB: >> { %v1653_v42 = vld [vmem:[%s2435_s28] sm:$0x3]  ;;  %s1655_s3 = sadd.s32 1, %s2439_s29  ;;  %s1647_s30 = sadd.s32 1, %s2443_s30   ;;  %s2443_s30 = sphi %s2441_s30, %s1647_s30   ;;  %s2439_s29 = sphi %s2437_s29, %s2438_s29   ;;  %s2435_s28 = sphi %s2433_s28, %s1660_s28   ;;  %s2431_s27 = sphi %s2429_s27, %s1661_s27  }
 0x163   : >> { %1654 = vst [vmem:[%s2431_s27] sm:$0x3] %v1653_v42  ;;  %p1656_p1 = scmp.ge.s32.totalorder %s1655_s3, %s2778_s23  ;;  %p1646_p2 = scmp.ge.s32.totalorder %s1647_s30, %s2778_s23 }
 0x165   : >> { %s2811_s3 = smov (%p1656_p1, %s1655_s3), 0  ;;  %1649 = sbr.rel (!%p1646_p2) target bundleno = 354 (0x162), region = 158 }
 0x166   : >> { %s1906_s4 = sshll.u32 %s2811_s3, 1  ;;  %s2438_s29 = smov %s2811_s3  }
 0x167   : >> { %s1660_s28 = scalar_lea.vmem %s1641_s25, %s1906_s4 [#allocation2]   ;;  %s1661_s27 = scalar_lea.vmem %s1643_s26, %s1906_s4  }
 0x16c PF: > { %p9_p3 = scmp.ge.s32.totalorder %s2478_s13, 4   ;;  %s2803_s9 = smov %s2407_s10 }
 0x16d   : > { %s2804_s10 = smov %s2486_s16  ;;  %s2805_s11 = smov %s2478_s13 }
 0x16e   :  { %11 = sbr.rel (!%p9_p3) target bundleno = 2 (0x2), region = 169 }

</bundles_post_ra>
